<compile_context>
chip_gen: v7x
topology: tpu7x:2x2x1
jax: 0.10.0
libtpu: 0.0.40
codegen_flags: <defaults>
</compile_context>

<pallas_src>
import math
import functools

import jax
import jax.numpy as jnp
from jax.experimental import pallas as pl
from jax.experimental.pallas import tpu as pltpu


def _round_up(x: int, m: int) -> int:
    return (x + m - 1) // m * m


def _spectrogram_kernel(basis_ref, cur_ref, nxt_ref, cplx_ref, logmag_ref):
    # basis_ref : (C, 2*F_pad, hop)   chunk c: rows [0:F_pad]=win*cos, [F_pad:]=-win*sin
    # cur_ref   : (1, hop, TN)        polyphase waveform block j   (frames on lanes)
    # nxt_ref   : (1, hop, TN)        polyphase waveform block j+1 (halo for the shifts)
    # cplx_ref  : (1, 2*F_pad, TN)    [re ; im] stacked on the sublane axis (f32)
    # logmag_ref: (1, F_pad, TN)      log1p(|X|) (f32)
    n_chunks = basis_ref.shape[0]
    tn = cur_ref.shape[2]
    f_pad = logmag_ref.shape[1]

    cur = cur_ref[0]                                                    # (hop, TN)
    acc = jnp.dot(basis_ref[0], cur, preferred_element_type=jnp.float32)
    if n_chunks > 1:
        full = jnp.concatenate([cur, nxt_ref[0]], axis=1)               # (hop, 2*TN)
        for c in range(1, n_chunks):                                    # static, small
            xs = full[:, c:c + tn]                                      # frame offset +c
            acc = acc + jnp.dot(basis_ref[c], xs,
                                preferred_element_type=jnp.float32)

    cplx_ref[0] = acc
    # Epilogue reads back from the output buffer (keeps vreg pressure low).
    re = cplx_ref[0, :f_pad, :]
    im = cplx_ref[0, f_pad:, :]
    logmag_ref[0] = jnp.log1p(jnp.sqrt(re * re + im * im))


def _hann_window(win_length: int) -> jnp.ndarray:
    # torch.hann_window default is periodic=True
    n = jnp.arange(win_length, dtype=jnp.float32)
    return 0.5 - 0.5 * jnp.cos(2.0 * math.pi * n / win_length)


def _windowed_basis(n_fft, win_length, n_freq, f_pad, n_chunks, hop):
    """(C, 2*F_pad, hop) windowed DFT basis, K split into hop-wide chunks."""
    win = _hann_window(win_length)
    left = (n_fft - win_length) // 2
    win = jnp.pad(win, (left, n_fft - win_length - left))                 # (n_fft,)
    # exact phase reduction in integers, then angle in [0, 2*pi)
    k = jnp.arange(n_freq, dtype=jnp.int32)[:, None]
    n = jnp.arange(n_fft, dtype=jnp.int32)[None, :]
    ang = (2.0 * math.pi / n_fft) * ((k * n) % n_fft).astype(jnp.float32)
    cos_w = jnp.cos(ang) * win[None, :]                                   # (n_freq, n_fft)
    sin_w = -jnp.sin(ang) * win[None, :]
    pad_rows = f_pad - n_freq                                             # zero rows -> zero output
    basis2 = jnp.concatenate([jnp.pad(cos_w, ((0, pad_rows), (0, 0))),
                              jnp.pad(sin_w, ((0, pad_rows), (0, 0)))], axis=0)  # (2*F_pad, n_fft)
    k_pad = n_chunks * hop
    basis2 = jnp.pad(basis2, ((0, 0), (0, k_pad - n_fft)))                # zero K columns
    return basis2.reshape(2 * f_pad, n_chunks, hop).transpose(1, 0, 2)    # (C, 2*F_pad, hop)


def _pick_tile(n_frames: int) -> int:
    tn = 128
    for cand in (256, 512):
        padded = _round_up(n_frames, cand)
        if n_frames >= cand and (padded - n_frames) * 8 <= padded:        # <=12.5% waste
            tn = cand
    return tn


@functools.partial(
    jax.jit, static_argnames=("n_fft", "win_length", "hop_length", "pad", "precision"))
def spectrogram_forward(waveform, *, n_fft, win_length, hop_length, pad,
                        precision="float32"):
    """Returns (spec_real, spec) matching the PyTorch module's forward.

    waveform:  (B, T) float32
    spec_real: (B, n_freq, n_frames) float32
    spec:      (B, n_freq, n_frames) complex64
    """
    B, T = waveform.shape
    n_freq = n_fft // 2 + 1
    compute_dtype = jnp.bfloat16 if precision == "bfloat16" else jnp.float32

    # ------- glue (plain JAX): padding + polyphase reshape (no frame gather) -------
    x = waveform.astype(jnp.float32)
    if pad > 0:
        x = jnp.pad(x, ((0, 0), (pad, pad)))                      # two-sided zero pad
    half = n_fft // 2
    x = jnp.pad(x, ((0, 0), (half, half)), mode="reflect")        # torch.stft center=True
    t_pad = x.shape[1]
    n_frames = 1 + (t_pad - n_fft) // hop_length

    tn = _pick_tile(n_frames)
    n_frames_pad = _round_up(n_frames, tn)
    f_pad = _round_up(n_freq, 8)                                  # 8-aligned re/im split
    n_chunks = -(-n_fft // hop_length)                            # ceil(n_fft / hop)
    assert n_chunks <= tn, "hop_length too small relative to n_fft for this tiling"

    # polyphase layout: x_r2[b, r, m] = x[b, m*hop + r]; +1 halo block for the j+1 spec
    m_pad = n_frames_pad + tn
    x = jnp.pad(x, ((0, 0), (0, m_pad * hop_length - t_pad)))
    x = x.astype(compute_dtype)
    x_r2 = x.reshape(B, m_pad, hop_length).transpose(0, 2, 1)     # (B, hop, M_pad)

    basis3 = _windowed_basis(n_fft, win_length, n_freq, f_pad,
                             n_chunks, hop_length).astype(compute_dtype)

    # ------- VMEM budget derived from tile sizes (cap 48 MiB: safe on v7x) -------
    itemsize = jnp.dtype(compute_dtype).itemsize
    basis_bytes = n_chunks * 2 * f_pad * _round_up(hop_length, 128) * itemsize  # x1 (Buffered(1))
    xr_bytes = 2 * 2 * _round_up(hop_length, 8) * tn * itemsize                 # 2 specs x 2 bufs
    out_bytes = 2 * (3 * f_pad) * tn * 4                                        # 2 outs x 2 bufs
    vmem_need = basis_bytes + xr_bytes + out_bytes
    vmem_limit = int(min(48 * 1024 * 1024, max(2 * vmem_need + (4 << 20), 16 << 20)))
    # TODO(synk): for n_fft >= 4096 the f32 basis no longer fits v7x VMEM even
    # single-buffered; add a freq-row-tiled third grid axis for that regime.

    # ------- Pallas hot path: chunked windowed-DFT matmuls + fused |.|+log1p -------
    grid = (B, n_frames_pad // tn)
    cplx_p, logmag_p = pl.pallas_call(
        _spectrogram_kernel,
        out_shape=(
            jax.ShapeDtypeStruct((B, 2 * f_pad, n_frames_pad), jnp.float32),
            jax.ShapeDtypeStruct((B, f_pad, n_frames_pad), jnp.float32),
        ),
        grid_spec=pltpu.PrefetchScalarGridSpec(
            num_scalar_prefetch=0,
            grid=grid,
            in_specs=[
                pl.BlockSpec((n_chunks, 2 * f_pad, hop_length),
                             lambda b, j: (0, 0, 0),
                             pipeline_mode=pl.Buffered(1)),       # constant basis, 1 buffer
                pl.BlockSpec((1, hop_length, tn), lambda b, j: (b, 0, j)),
                pl.BlockSpec((1, hop_length, tn), lambda b, j: (b, 0, j + 1)),
            ],
            out_specs=[
                pl.BlockSpec((1, 2 * f_pad, tn), lambda b, j: (b, 0, j)),
                pl.BlockSpec((1, f_pad, tn), lambda b, j: (b, 0, j)),
            ],
        ),
        compiler_params=pltpu.CompilerParams(
            dimension_semantics=("parallel", "parallel"),
            vmem_limit_bytes=vmem_limit,
        ),
    )(basis3, x_r2, x_r2)

    # ------- glue: strip padding; layout is already (B, freq, frames) -------
    spec_real = logmag_p[:, :n_freq, :n_frames]
    real = cplx_p[:, :n_freq, :n_frames]
    imag = cplx_p[:, f_pad:f_pad + n_freq, :n_frames]
    spec = jax.lax.complex(real, imag)                            # complex64, power=None path
    return spec_real, spec


def _reference(waveform, n_fft, win_length, hop_length, pad):
    """Pure-JAX reference (rfft) mirroring torch.stft center/reflect semantics."""
    x = waveform.astype(jnp.float32)
    if pad > 0:
        x = jnp.pad(x, ((0, 0), (pad, pad)))
    half = n_fft // 2
    x = jnp.pad(x, ((0, 0), (half, half)), mode="reflect")
    n_frames = 1 + (x.shape[1] - n_fft) // hop_length
    idx = jnp.arange(n_frames)[:, None] * hop_length + jnp.arange(n_fft)[None, :]
    frames = x[:, idx]                                            # (B, n_frames, n_fft)
    win = _hann_window(win_length)
    left = (n_fft - win_length) // 2
    win = jnp.pad(win, (left, n_fft - win_length - left))
    frames = frames * win[None, None, :]
    spec = jnp.fft.rfft(frames, axis=-1)                          # (B, n_frames, n_freq)
    spec = jnp.transpose(spec, (0, 2, 1))                         # (B, n_freq, n_frames)
    return jnp.log1p(jnp.abs(spec)), spec


if __name__ == "__main__":
    # Small, deterministic example (module defaults scaled down):
    # n_fft=64 -> 33 freq bins, win_length=n_fft, hop=win//2
    n_fft, win_length, hop_length, pad = 64, 64, 32, 0
    B, T = 2, 256

    key = jax.random.PRNGKey(0)
    waveform = jax.random.normal(key, (B, T), dtype=jnp.float32)

    spec_real, spec = spectrogram_forward(
        waveform, n_fft=n_fft, win_length=win_length,
        hop_length=hop_length, pad=pad)
    jax.block_until_ready((spec_real, spec))

    # sanity: expected shapes (B, n_fft//2+1, 1 + T//hop)
    n_freq = n_fft // 2 + 1
    n_frames = 1 + T // hop_length
    assert spec.shape == (B, n_freq, n_frames) and spec.dtype == jnp.complex64
    assert spec_real.shape == (B, n_freq, n_frames) and spec_real.dtype == jnp.float32
    assert bool(jnp.all(jnp.isfinite(spec_real)))

    # numerical check vs pure-JAX rfft reference (f32 path)
    ref_real, ref_spec = _reference(waveform, n_fft, win_length, hop_length, pad)
    jax.block_until_ready((ref_real, ref_spec))
    assert float(jnp.max(jnp.abs(spec_real - ref_real))) < 1e-2
    assert float(jnp.max(jnp.abs(spec - ref_spec))) < 1e-2

    # optional reduced-precision path (bf16 matmul inputs, f32 accumulation)
    spec_real_bf, spec_bf = spectrogram_forward(
        waveform, n_fft=n_fft, win_length=win_length,
        hop_length=hop_length, pad=pad, precision="bfloat16")
    jax.block_until_ready((spec_real_bf, spec_bf))
    assert spec_bf.shape == (B, n_freq, n_frames)
    assert bool(jnp.all(jnp.isfinite(spec_real_bf)))
    assert float(jnp.max(jnp.abs(spec_real_bf - ref_real))) < 0.5   # loose: bf16 inputs

    print("KERNEL_OK")
</pallas_src>

<mosaic_0001>
module attributes {stable_mosaic.version = 11 : i64} {
  func.func @_spectrogram_kernel(%arg0: i32, %arg1: i32, %arg2: memref<2x80x32xf32, #tpu.memory_space<vmem>>, %arg3: memref<1x32x128xf32, #tpu.memory_space<vmem>>, %arg4: memref<1x32x128xf32, #tpu.memory_space<vmem>>, %arg5: memref<1x80x128xf32, #tpu.memory_space<vmem>>, %arg6: memref<1x40x128xf32, #tpu.memory_space<vmem>>) attributes {dimension_semantics = [#tpu.dimension_semantics<parallel>, #tpu.dimension_semantics<parallel>], iteration_bounds = array<i64: 2, 1>, scalar_prefetch = 0 : i64, scratch_operands = 0 : i64, tpu.core_type = #tpu.core_type<tc>, window_params = [{pipeline_mode = #tpu.pipeline_mode<synchronous>, transform_indices = @transform_0, window_bounds = array<i64: 2, 80, 32>}, {transform_indices = @transform_1, window_bounds = array<i64: 1, 32, 128>}, {transform_indices = @transform_2, window_bounds = array<i64: 1, 32, 128>}, {transform_indices = @transform_3, window_bounds = array<i64: 1, 80, 128>}, {transform_indices = @transform_4, window_bounds = array<i64: 1, 40, 128>}]} {
    %c0 = arith.constant 0 : index
    %c0_0 = arith.constant 0 : index
    %c0_1 = arith.constant 0 : index
    %0 = vector.load %arg3[%c0, %c0_0, %c0_1] : memref<1x32x128xf32, #tpu.memory_space<vmem>>, vector<1x32x128xf32>
    %1 = vector.shape_cast %0 : vector<1x32x128xf32> to vector<32x128xf32>
    %c0_2 = arith.constant 0 : index
    %c0_3 = arith.constant 0 : index
    %c0_4 = arith.constant 0 : index
    %2 = vector.load %arg2[%c0_2, %c0_3, %c0_4] : memref<2x80x32xf32, #tpu.memory_space<vmem>>, vector<1x80x32xf32>
    %3 = vector.shape_cast %2 : vector<1x80x32xf32> to vector<80x32xf32>
    %cst = arith.constant dense<0.000000e+00> : vector<80x128xf32>
    %4 = tpu.matmul %3, %1, %cst {dimension_numbers = #tpu.dot_dimension_numbers<[1], [0], [0], [1], [0, 0, 1, 1], [], []>} : vector<80x32xf32>, vector<32x128xf32>, vector<80x128xf32> -> vector<80x128xf32>
    %c0_5 = arith.constant 0 : index
    %c0_6 = arith.constant 0 : index
    %c0_7 = arith.constant 0 : index
    %5 = vector.load %arg4[%c0_5, %c0_6, %c0_7] : memref<1x32x128xf32, #tpu.memory_space<vmem>>, vector<1x32x128xf32>
    %6 = vector.shape_cast %5 : vector<1x32x128xf32> to vector<32x128xf32>
    %7 = tpu.concatenate %1, %6 in 1 : vector<32x128xf32>, vector<32x128xf32> -> vector<32x256xf32>
    %8 = vector.extract_strided_slice %7 {offsets = [0, 1], sizes = [32, 128], strides = [1, 1]} : vector<32x256xf32> to vector<32x128xf32>
    %c1 = arith.constant 1 : index
    %c0_8 = arith.constant 0 : index
    %c0_9 = arith.constant 0 : index
    %9 = vector.load %arg2[%c1, %c0_8, %c0_9] : memref<2x80x32xf32, #tpu.memory_space<vmem>>, vector<1x80x32xf32>
    %10 = vector.shape_cast %9 : vector<1x80x32xf32> to vector<80x32xf32>
    %cst_10 = arith.constant dense<0.000000e+00> : vector<80x128xf32>
    %11 = tpu.matmul %10, %8, %cst_10 {dimension_numbers = #tpu.dot_dimension_numbers<[1], [0], [0], [1], [0, 0, 1, 1], [], []>} : vector<80x32xf32>, vector<32x128xf32>, vector<80x128xf32> -> vector<80x128xf32>
    %12 = arith.addf %4, %11 : vector<80x128xf32>
    %c0_11 = arith.constant 0 : index
    %c0_12 = arith.constant 0 : index
    %c0_13 = arith.constant 0 : index
    %13 = vector.load %arg5[%c0_11, %c0_12, %c0_13] : memref<1x80x128xf32, #tpu.memory_space<vmem>>, vector<1x80x128xf32>
    %14 = vector.shape_cast %13 : vector<1x80x128xf32> to vector<80x128xf32>
    %15 = vector.shape_cast %12 : vector<80x128xf32> to vector<1x80x128xf32>
    tpu.vector_store %arg5[%c0_11, %c0_12, %c0_13], %15 {strides = array<i32>} : memref<1x80x128xf32, #tpu.memory_space<vmem>>, vector<1x80x128xf32>,
    %c0_14 = arith.constant 0 : index
    %c0_15 = arith.constant 0 : index
    %c0_16 = arith.constant 0 : index
    %16 = vector.load %arg5[%c0_14, %c0_15, %c0_16] : memref<1x80x128xf32, #tpu.memory_space<vmem>>, vector<1x40x128xf32>
    %17 = vector.shape_cast %16 : vector<1x40x128xf32> to vector<40x128xf32>
    %c0_17 = arith.constant 0 : index
    %c40 = arith.constant 40 : index
    %c0_18 = arith.constant 0 : index
    %18 = vector.load %arg5[%c0_17, %c40, %c0_18] : memref<1x80x128xf32, #tpu.memory_space<vmem>>, vector<1x40x128xf32>
    %19 = vector.shape_cast %18 : vector<1x40x128xf32> to vector<40x128xf32>
    %20 = arith.mulf %17, %17 : vector<40x128xf32>
    %21 = arith.mulf %19, %19 : vector<40x128xf32>
    %22 = arith.addf %20, %21 : vector<40x128xf32>
    %23 = math.sqrt %22 : vector<40x128xf32>
    %24 = math.log1p %23 : vector<40x128xf32>
    %c0_19 = arith.constant 0 : index
    %c0_20 = arith.constant 0 : index
    %c0_21 = arith.constant 0 : index
    %25 = vector.load %arg6[%c0_19, %c0_20, %c0_21] : memref<1x40x128xf32, #tpu.memory_space<vmem>>, vector<1x40x128xf32>
    %26 = vector.shape_cast %25 : vector<1x40x128xf32> to vector<40x128xf32>
    %27 = vector.shape_cast %24 : vector<40x128xf32> to vector<1x40x128xf32>
    tpu.vector_store %arg6[%c0_19, %c0_20, %c0_21], %27 {strides = array<i32>} : memref<1x40x128xf32, #tpu.memory_space<vmem>>, vector<1x40x128xf32>,
    return
  }
  func.func @transform_0(%arg0: i32, %arg1: i32) -> (i32, i32, i32) {
    %c0_i32 = arith.constant 0 : i32
    %c0_i32_0 = arith.constant 0 : i32
    %c0_i32_1 = arith.constant 0 : i32
    %c0_i32_2 = arith.constant 0 : i32
    return %c0_i32, %c0_i32_0, %c0_i32_1 : i32, i32, i32
  }
  func.func @transform_1(%arg0: i32, %arg1: i32) -> (i32, i32, i32) {
    %c0_i32 = arith.constant 0 : i32
    %c0_i32_0 = arith.constant 0 : i32
    return %arg0, %c0_i32, %arg1 : i32, i32, i32
  }
  func.func @transform_2(%arg0: i32, %arg1: i32) -> (i32, i32, i32) {
    %c1_i32 = arith.constant 1 : i32
    %0 = arith.addi %arg1, %c1_i32 : i32
    %c0_i32 = arith.constant 0 : i32
    %c0_i32_0 = arith.constant 0 : i32
    return %arg0, %c0_i32, %0 : i32, i32, i32
  }
  func.func @transform_3(%arg0: i32, %arg1: i32) -> (i32, i32, i32) {
    %c0_i32 = arith.constant 0 : i32
    %c0_i32_0 = arith.constant 0 : i32
    return %arg0, %c0_i32, %arg1 : i32, i32, i32
  }
  func.func @transform_4(%arg0: i32, %arg1: i32) -> (i32, i32, i32) {
    %c0_i32 = arith.constant 0 : i32
    %c0_i32_0 = arith.constant 0 : i32
    return %arg0, %c0_i32, %arg1 : i32, i32, i32
  }
}

</mosaic_0001>

<bundles_post_ra>
// kernel: custom-call
= control target key start
LH: loop header
LB: loop body
LE: loop exit
PB: predicated region body
PF: predicated region fallthrough
CT: control target
= control target key end

     0   :  { %s262_s0 = inlined_call_operand.vmem [shape: f32[2,33,9], index: 0, kind: input, shape index: {}]   ;;  %s263_s2 = inlined_call_operand.vmem [shape: c64[2,33,9], index: 2, kind: output, shape index: {}]   ;;  %s264_s1 = inlined_call_operand.vmem [shape: f32[2,33,9], index: 1, kind: input, shape index: {}]  }
   0x1   :  { %v5_v0 = vld [vmem:[%s262_s0] sm:$0xff]  ;;  %v90_v1 = vld [vmem:[%s262_s0 + $0x8] sm:$0xff]  ;;  %v92_v2 = vld [vmem:[%s262_s0 + $0x10] sm:$0xff] }
   0x2   :  { %6 = vst [vmem:[%s263_s2] sm:$0xff] %v5_v0  ;;  %91 = vst [vmem:[%s263_s2 + $0x8] sm:$0xff] %v90_v1  ;;  %v94_v3 = vld [vmem:[%s262_s0 + $0x18] sm:$0xff]  ;;  %v96_v4 = vld [vmem:[%s262_s0 + $0x20] sm:$0xff] }
   0x3   :  { %93 = vst [vmem:[%s263_s2 + $0x10] sm:$0xff] %v92_v2  ;;  %v98_v5 = vld [vmem:[%s262_s0 + $0x28] sm:$0xff]  ;;  %95 = vst [vmem:[%s263_s2 + $0x18] sm:$0xff] %v94_v3  ;;  %v100_v6 = vld [vmem:[%s262_s0 + $0x30] sm:$0xff] }
   0x4   :  { %97 = vst [vmem:[%s263_s2 + $0x20] sm:$0xff] %v96_v4  ;;  %99 = vst [vmem:[%s263_s2 + $0x28] sm:$0xff] %v98_v5  ;;  %v102_v7 = vld [vmem:[%s262_s0 + $0x38] sm:$0xff]  ;;  %v104_v8 = vld [vmem:[%s262_s0 + $0x40] sm:$0xff] }
   0x5   :  { %101 = vst [vmem:[%s263_s2 + $0x30] sm:$0xff] %v100_v6  ;;  %103 = vst [vmem:[%s263_s2 + $0x38] sm:$0xff] %v102_v7  ;;  %v106_v9 = vld [vmem:[%s262_s0 + $0x48] sm:$0xff]  ;;  %v43_v10 = vld [vmem:[%s264_s1] sm:$0xff] }
   0x6   :  { %105 = vst [vmem:[%s263_s2 + $0x40] sm:$0xff] %v104_v8  ;;  %v109_v11 = vld [vmem:[%s264_s1 + $0x8] sm:$0xff]  ;;  %107 = vst [vmem:[%s263_s2 + $0x48] sm:$0xff] %v106_v9  ;;  %v111_v12 = vld [vmem:[%s264_s1 + $0x10] sm:$0xff] }
   0x7   :  { %108 = vst [vmem:[%s263_s2 + $0x50] sm:$0xff] %v43_v10  ;;  %110 = vst [vmem:[%s263_s2 + $0x58] sm:$0xff] %v109_v11  ;;  %v113_v13 = vld [vmem:[%s264_s1 + $0x18] sm:$0xff]  ;;  %v115_v14 = vld [vmem:[%s264_s1 + $0x20] sm:$0xff] }
   0x8   :  { %112 = vst [vmem:[%s263_s2 + $0x60] sm:$0xff] %v111_v12  ;;  %114 = vst [vmem:[%s263_s2 + $0x68] sm:$0xff] %v113_v13  ;;  %v117_v15 = vld [vmem:[%s264_s1 + $0x28] sm:$0xff]  ;;  %v119_v16 = vld [vmem:[%s264_s1 + $0x30] sm:$0xff] }
   0x9   :  { %116 = vst [vmem:[%s263_s2 + $0x70] sm:$0xff] %v115_v14  ;;  %v121_v17 = vld [vmem:[%s264_s1 + $0x38] sm:$0xff]  ;;  %118 = vst [vmem:[%s263_s2 + $0x78] sm:$0xff] %v117_v15  ;;  %v123_v18 = vld [vmem:[%s264_s1 + $0x40] sm:$0xff] }
   0xa   :  { %120 = vst [vmem:[%s263_s2 + $0x80] sm:$0xff] %v119_v16  ;;  %122 = vst [vmem:[%s263_s2 + $0x88] sm:$0xff] %v121_v17  ;;  %v125_v19 = vld [vmem:[%s264_s1 + $0x48] sm:$0xff] }
   0xb   :  { %124 = vst [vmem:[%s263_s2 + $0x90] sm:$0xff] %v123_v18  ;;  %126 = vst [vmem:[%s263_s2 + $0x98] sm:$0xff] %v125_v19 }

// kernel: spectrogram_forward.1
= control target key start
LH: loop header
LB: loop body
LE: loop exit
PB: predicated region body
PF: predicated region fallthrough
CT: control target
= control target key end

     0   :  { %s1291_s15 = smov 0   ;;  %s1293_s16 = smov 0   ;;  %s1476_s0 = inlined_call_operand.vmem [shape: f32[2,80,32], index: 0, kind: input, shape index: {}]   ;;  %s1477_s1 = inlined_call_operand.vmem [shape: f32[2,32,256], index: 1, kind: input, shape index: {}, may-alias: {1,2}]   ;;  %s1478_s2 = inlined_call_operand.vmem [shape: f32[2,32,256], index: 2, kind: input, shape index: {}, may-alias: {1,2}]   ;;  %s1479_s3 = inlined_call_operand.vmem [shape: f32[2,80,128], index: 3, kind: output, shape index: {0}]   ;;  %s1480_s4 = inlined_call_operand.vmem [shape: f32[2,40,128], index: 4, kind: output, shape index: {1}]  }
   0x1   :  { %s1295_s17 = smov 0   ;;  %s1297_s18 = smov 0  }
   0x2   :  { %s1299_s19 = smov 0  }
   0x3 LB: > { %s27_s20 = sadd.s32 1, %s1259_s18  ;;  %p64_p1 = scmp.ne.s32.totalorder %s1251_s16, %s1247_s15  ;;  %s1263_s19 = sphi %s1299_s19, %s15_s19   ;;  %s1259_s18 = sphi %s1297_s18, %s1485_s18   ;;  %s1255_s17 = sphi %s1295_s17, %s1484_s17   ;;  %s1251_s16 = sphi %s1293_s16, %s1483_s16   ;;  %s1247_s15 = sphi %s1291_s15, %s1482_s15  }
   0x4   : > { %p29_p0 = scmp.ge.s32.totalorder %s27_s20, 2  ;;  %p65_p2 = scmp.eq.s32.totalorder %s1263_s19, 0 }
   0x5   : > { %s57_s23 = sadd.s32 1, %s1251_s16  ;;  %p992_p5 = scmp.ge.s32.totalorder %s1263_s19, 2 }
   0x6   : > { %s1487_s20 = smov (%p29_p0, %s27_s20), 0  ;;  %p1322_p3 = por %p65_p2, %p64_p1 }
   0x7   : > { %s52_s22 = ssub.s32 %s1259_s18, %s1487_s20  ;;  %179 = sbr.rel (%p992_p5) target bundleno = 28 (0x1c), region = 20 }
   0x8   : > { %p55_p4 = scmp.eq.s32.totalorder %s52_s22, 0 }
   0xa   : > { %s1330_s24 = scalar_select %p55_p4, %s1251_s16, %s57_s23  }
   0xe   : > { %182 = sbr.rel (!%p1322_p3) target bundleno = 21 (0x15), region = 24  ;;  %s184_s25 = sand.u32 (%p1322_p3), 1, %s1251_s16  }
   0xf   : > { %s1040_s26 = sshll.u32 (%p1322_p3), %s1259_s18, 6  ;;  %s993_s27 = sshll.u32 (%p1322_p3), %s184_s25, 5 }
  0x10   : > { %s190_s30 = scalar_lea.vmem (%p1322_p3), %s1477_s1, %s1040_s26  ;;  %s186_s5 = scalar_lea.vmem (%p1322_p3), [#allocation2], %s993_s27 }
  0x11   : > { %v224_v0 = vld [vmem:[%s190_s30] sm:$0xff] (%p1322_p3)  ;;  %v226_v1 = vld [vmem:[%s190_s30 + $0x10] sm:$0xff] (%p1322_p3) }
  0x12   : > { %v228_v2 = vld [vmem:[%s190_s30 + $0x20] sm:$0xff] (%p1322_p3)  ;;  %225 = vst [vmem:[%s186_s5] sm:$0xff] (%p1322_p3), %v224_v0  ;;  %227 = vst [vmem:[%s186_s5 + $0x8] sm:$0xff] (%p1322_p3), %v226_v1  ;;  %v230_v3 = vld [vmem:[%s190_s30 + $0x30] sm:$0xff] (%p1322_p3) }
  0x13   : > { %229 = vst [vmem:[%s186_s5 + $0x10] sm:$0xff] (%p1322_p3), %v228_v2  ;;  %231 = vst [vmem:[%s186_s5 + $0x18] sm:$0xff] (%p1322_p3), %v230_v3 }
  0x15 PF: > { %237 = sbr.rel (!%p1322_p3) target bundleno = 28 (0x1c), region = 62  ;;  %s239_s6 = sand.u32 (%p1322_p3), 1, %s1251_s16  }
  0x16   : > { %s1041_s7 = sshll.u32 (%p1322_p3), %s1259_s18, 6  ;;  %s996_s8 = sshll.u32 (%p1322_p3), %s239_s6, 5 }
  0x17   : > { %s896_s11 = scalar_lea.vmem (%p1322_p3), %s1478_s2, %s1041_s7  ;;  %s241_s12 = scalar_lea.vmem (%p1322_p3), [#allocation3], %s996_s8 }
  0x18   : > { %v999_v4 = vld [vmem:[%s896_s11 + $0x8] sm:$0xff] (%p1322_p3)  ;;  %v1000_v5 = vld [vmem:[%s896_s11 + $0x18] sm:$0xff] (%p1322_p3) }
  0x19   : > { %v1001_v6 = vld [vmem:[%s896_s11 + $0x28] sm:$0xff] (%p1322_p3)  ;;  %281 = vst [vmem:[%s241_s12] sm:$0xff] (%p1322_p3), %v999_v4  ;;  %283 = vst [vmem:[%s241_s12 + $0x8] sm:$0xff] (%p1322_p3), %v1000_v5  ;;  %v1002_v7 = vld [vmem:[%s896_s11 + $0x38] sm:$0xff] (%p1322_p3) }
  0x1a   : > { %285 = vst [vmem:[%s241_s12 + $0x10] sm:$0xff] (%p1322_p3), %v1001_v6  ;;  %287 = vst [vmem:[%s241_s12 + $0x18] sm:$0xff] (%p1322_p3), %v1002_v7 }
  0x1c PF: > { %p1003_p6 = scmp.ge.s32.totalorder %s1263_s19, 1  ;;  %p292_p7 = scmp.lt.s32.totalorder %s1263_s19, 3 }
  0x1e   : > { %p293_p8 = pnand %p1003_p6, %p292_p7 }
  0x1f   : > { %s299_s13 = sand.u32 (!%p293_p8), 1, %s1247_s15   ;;  %s1265_s23 = smov (!%p293_p8), 127   ;;  %v367_v22 = vld [vmem:[%s1476_s0] sm:$0xff] (!%p293_p8)  ;;  %vm425_vm0 = vcmask (!%p293_p8), 261120   ;;  %v1008_v23 = vld [vmem:[%s1476_s0 + $0x50] sm:$0xff] (!%p293_p8)  ;;  %v368_v24 = vld [vmem:[%s1476_s0 + $0x8] sm:$0xff] (!%p293_p8) }
  0x20   : > { %296 = sbr.rel (%p293_p8) target bundleno = 437 (0x1b5), region = 100  ;;  %s1004_s14 = sshll.u32 (!%p293_p8), %s299_s13, 5  ;;  %1101 = vmatprep.mubr.msk.f32.mxu0 (!%p293_p8), %vm425_vm0, %v367_v22  ;;  %1078 = vmatprep.mubr.msk.f32.mxu1 (!%p293_p8), %vm425_vm0, %v1008_v23  ;;  %v369_v25 = vld [vmem:[%s1476_s0 + $0x10] sm:$0xff] (!%p293_p8)  ;;  %v370_v26 = vld [vmem:[%s1476_s0 + $0x18] sm:$0xff] (!%p293_p8)  ;;  %v371_v27 = vld [vmem:[%s1476_s0 + $0x20] sm:$0xff] (!%p293_p8)  ;;  %vm416_vm1 = vcmask (!%p293_p8), 1039360  }
  0x21   : > { %s301_s21 = scalar_lea.vmem (!%p293_p8), [#allocation2], %s1004_s14  ;;  %s308_s22 = scalar_lea.vmem (!%p293_p8), [#allocation3], %s1004_s14  ;;  %v372_v28 = vld [vmem:[%s1476_s0 + $0x28] sm:$0xff] (!%p293_p8)  ;;  %v373_v29 = vld [vmem:[%s1476_s0 + $0x30] sm:$0xff] (!%p293_p8)  ;;  %v374_v30 = vld [vmem:[%s1476_s0 + $0x38] sm:$0xff] (!%p293_p8) }
  0x22   : > { %v365_v8 = vld [vmem:[%s301_s21 + $0x10] sm:$0xff] (!%p293_p8)  ;;  %v366_v9 = vld [vmem:[%s301_s21 + $0x18] sm:$0xff] (!%p293_p8)  ;;  %v363_v12 = vld [vmem:[%s301_s21] sm:$0xff] (!%p293_p8)  ;;  %p347_p9 = scmp.lt.s32.totalorder (!%p293_p8), %s1255_s17, 1 }
  0x23   : > { %v379_v10 = vld [vmem:[%s308_s22 + $0x10] sm:$0xff] (!%p293_p8)  ;;  %v377_v13 = vld [vmem:[%s308_s22] sm:$0xff] (!%p293_p8)  ;;  %v380_v14 = vld [vmem:[%s308_s22 + $0x18] sm:$0xff] (!%p293_p8)  ;;  %v1128_v18 = vpack.c.bf16 (!%p293_p8), %v366_v9, %v365_v8 }
  0x24   : > { %v1195_v11 = vpack.i.bf16 (!%p293_p8), %v379_v10, %v365_v8  ;;  %v1185_v15 = vpack.i.bf16 (!%p293_p8), %v377_v13, %v363_v12  ;;  %v364_v16 = vld [vmem:[%s301_s21 + $0x8] sm:$0xff] (!%p293_p8)  ;;  %v1200_v19 = vpack.i.bf16 (!%p293_p8), %v380_v14, %v366_v9  ;;  %v375_v31 = vld [vmem:[%s1476_s0 + $0x40] sm:$0xff] (!%p293_p8)  ;;  %v1009_v51 = vld [vmem:[%s1476_s0 + $0x58] sm:$0xff] (!%p293_p8) }
  0x25   : > { %v378_v17 = vld [vmem:[%s308_s22 + $0x8] sm:$0xff] (!%p293_p8)  ;;  %v1124_v20 = vpack.c.bf16 (!%p293_p8), %v364_v16, %v363_v12  ;;  %v1010_v52 = vld [vmem:[%s1476_s0 + $0x60] sm:$0xff] (!%p293_p8)  ;;  %v1012_v54 = vld [vmem:[%s1476_s0 + $0x70] sm:$0xff] (!%p293_p8) }
  0x26   : > { %1196 = vrot.lane.b32.xlu1 (!%p293_p8), %v1195_v11, %s1265_s23  ;;  %1186 = vrot.lane.b32.xlu0 (!%p293_p8), %v1185_v15, %s1265_s23  ;;  %v1190_v21 = vpack.i.bf16 (!%p293_p8), %v378_v17, %v364_v16  ;;  %v376_v32 = vld [vmem:[%s1476_s0 + $0x48] sm:$0xff] (!%p293_p8)  ;;  %v1013_v55 = vld [vmem:[%s1476_s0 + $0x78] sm:$0xff] (!%p293_p8) }
  0x27   : > { %1125 = vmatprep.subr.bf16.mxu0 %v1124_v20  ;;  %v1011_v53 = vld [vmem:[%s1476_s0 + $0x68] sm:$0xff]  ;;  %v1014_v56 = vld [vmem:[%s1476_s0 + $0x80] sm:$0xff]  ;;  %v1016_v58 = vld [vmem:[%s1476_s0 + $0x90] sm:$0xff]  ;;  %s1489_s17 = smov (!%p347_p9, %s1255_s17), 1 }
  0x28   : > { %1127 = vmatpush3.bf16.msra.mxu0 %v1124_v20  ;;  %v1015_v57 = vld [vmem:[%s1476_s0 + $0x88] sm:$0xff]  ;;  %v1017_v59 = vld [vmem:[%s1476_s0 + $0x98] sm:$0xff]  ;;  %s1142_s15 = smul.u32 80, %s1489_s17 }
  0x29   : > { %1129 = vmatprep.subr.bf16.mxu0 %v1128_v18  ;;  %s1143_s28 = smul.u32 40, %s1489_s17 }
  0x2a   : > { %1201 = vrot.lane.b32.xlu1 %v1200_v19, %s1265_s23  ;;  %1191 = vrot.lane.b32.xlu0 %v1190_v21, %s1265_s23  ;;  %s1438_s27 = scalar_lea.vmem %s1479_s3, %s1142_s15 }
  0x2b   : > { %s1454_s5 = scalar_lea.vmem %s1480_s4, %s1143_s28 }
  0x2c   : > { %1131 = vmatpush3.bf16.msra.mxu0 %v1128_v18 }
  0x2f   : > { %1102 = vmatmul.mubr.msk.f32.vlgmr.msra.gmra.mrb[0].mxu0 %vm425_vm0, %v368_v24 }
  0x30   : > { %1104 = vmatprep.mubr.msk.f32.mxu0 %vm425_vm0, %v369_v25 }
  0x33   : > { %1105 = vmatmul.mubr.msk.f32.gmra.mrb[2].mxu0 %vm425_vm0, %v370_v26 }
  0x34   : > { %1107 = vmatprep.mubr.msk.f32.mxu0 %vm425_vm0, %v371_v27 }
  0x37   : > { %1108 = vmatmul.mubr.msk.f32.gmra.mrb[4].mxu0 %vm425_vm0, %v372_v28 }
  0x38   : > { %1110 = vmatprep.mubr.msk.f32.mxu0 %vm425_vm0, %v373_v29 }
  0x3b   : > { %1111 = vmatmul.mubr.msk.f32.gmra.mrb[6].mxu0 %vm425_vm0, %v374_v30 }
  0x3c   : > { %1113 = vmatprep.mubr.msk.f32.mxu0 %vm425_vm0, %v375_v31 }
  0x3f   : > { %1114 = vmatmul.mubr.msk.f32.gmra.mrb[8].mxu0 %vm425_vm0, %v376_v32 }
  0x98   : > { %v1197_v33 = vpop.permute.xlu1 %1196  ;;  %v1187_v34 = vpop.permute.xlu0 %1186 }
  0x99   : > { %v1199_v35 = vunpack.i.h.bf16 %v1197_v33  ;;  %v1198_v36 = vunpack.i.l.bf16 %v1197_v33  ;;  %v1189_v37 = vunpack.i.h.bf16 %v1187_v34  ;;  %v1188_v38 = vunpack.i.l.bf16 %v1187_v34 }
  0x9b   : > { %v417_v45 = vsel %vm416_vm1, %v1188_v38, %v1189_v37  ;;  %v419_v47 = vsel %vm416_vm1, %v1198_v36, %v1199_v35 }
  0x9c   : > { %v1202_v39 = vpop.permute.xlu1 %1201  ;;  %v1192_v42 = vpop.permute.xlu0 %1191 }
  0x9d   : > { %v1204_v40 = vunpack.i.h.bf16 %v1202_v39  ;;  %v1203_v41 = vunpack.i.l.bf16 %v1202_v39  ;;  %v1194_v43 = vunpack.i.h.bf16 %v1192_v42  ;;  %v1193_v44 = vunpack.i.l.bf16 %v1192_v42 }
  0x9f   : > { %v418_v46 = vsel %vm416_vm1, %v1193_v44, %v1194_v43  ;;  %v420_v48 = vsel %vm416_vm1, %v1203_v41, %v1204_v40 }
  0xa0   : > { %v1116_v49 = vpack.c.bf16 %v418_v46, %v417_v45  ;;  %v1120_v50 = vpack.c.bf16 %v420_v48, %v419_v47 }
  0xa2   : > { %1117 = vmatprep.subr.bf16.mxu1 %v1116_v49 }
  0xa3   : > { %1119 = vmatpush3.bf16.msra.mxu1 %v1116_v49 }
  0xa4   : > { %1121 = vmatprep.subr.bf16.mxu1 %v1120_v50 }
  0xa7   : > { %1123 = vmatpush3.bf16.msra.mxu1 %v1120_v50 }
  0xaa   : > { %1079 = vmatmul.mubr.msk.f32.vlgmr.msra.gmra.mrb[0].mxu1 %vm425_vm0, %v1009_v51 }
  0xab   : > { %1081 = vmatprep.mubr.msk.f32.mxu1 %vm425_vm0, %v1010_v52 }
  0xae   : > { %1082 = vmatmul.mubr.msk.f32.gmra.mrb[2].mxu1 %vm425_vm0, %v1011_v53 }
  0xaf   : > { %1084 = vmatprep.mubr.msk.f32.mxu1 %vm425_vm0, %v1012_v54 }
  0xb2   : > { %1085 = vmatmul.mubr.msk.f32.gmra.mrb[4].mxu1 %vm425_vm0, %v1013_v55 }
  0xb3   : > { %1087 = vmatprep.mubr.msk.f32.mxu1 %vm425_vm0, %v1014_v56 }
  0xb6   : > { %1088 = vmatmul.mubr.msk.f32.gmra.mrb[6].mxu1 %vm425_vm0, %v1015_v57 }
  0xb7   : > { %1090 = vmatprep.mubr.msk.f32.mxu1 %vm425_vm0, %v1016_v58 }
  0xba   : > { %1091 = vmatmul.mubr.msk.f32.gmra.mrb[8].mxu1 %vm425_vm0, %v1017_v59 }
 0x102   : > { %v1103_v60 = vpop.f32.mrb[0].mxu0 }
 0x103   : > { %v667_v61 = vpop.f32.mrb[1].mxu0 }
 0x106   : > { %v1106_v62 = vpop.f32.mrb[2].mxu0 }
 0x107   : > { %v677_v63 = vpop.f32.mrb[3].mxu0 }
 0x10a   : > { %v1109_v0 = vpop.f32.mrb[4].mxu0 }
 0x10b   : > { %v687_v1 = vpop.f32.mrb[5].mxu0 }
 0x10e   : > { %v1112_v2 = vpop.f32.mrb[6].mxu0 }
 0x10f   : > { %v697_v3 = vpop.f32.mrb[7].mxu0 }
 0x112   : > { %v1115_v4 = vpop.f32.mrb[8].mxu0 }
 0x113   : > { %v707_v5 = vpop.f32.mrb[9].mxu0 }
 0x17d   : > { %v1080_v6 = vpop.f32.mrb[0].mxu1 }
 0x17e   : > { %v673_v7 = vadd.f32 %v1103_v60, %v1080_v6  ;;  %v522_v8 = vpop.f32.mrb[1].mxu1 }
 0x17f   : > { %v668_v9 = vadd.f32 %v667_v61, %v522_v8 }
 0x180   : > { %717 = vst [vmem:[%s1438_s27 + $0x8] sm:$0xff] %v673_v7  ;;  %v737_v25 = vmul.f32 %v673_v7, %v673_v7 }
 0x181   : > { %716 = vst [vmem:[%s1438_s27] sm:$0xff] %v668_v9  ;;  %v1083_v10 = vpop.f32.mrb[2].mxu1  ;;  %v736_v18 = vmul.f32 %v668_v9, %v668_v9 }
 0x182   : > { %v683_v11 = vadd.f32 %v1106_v62, %v1083_v10  ;;  %v532_v12 = vpop.f32.mrb[3].mxu1 }
 0x183   : > { %v678_v13 = vadd.f32 %v677_v63, %v532_v12 }
 0x184   : > { %719 = vst [vmem:[%s1438_s27 + $0x18] sm:$0xff] %v683_v11  ;;  %v739_v39 = vmul.f32 %v683_v11, %v683_v11 }
 0x185   : > { %718 = vst [vmem:[%s1438_s27 + $0x10] sm:$0xff] %v678_v13  ;;  %v1086_v14 = vpop.f32.mrb[4].mxu1  ;;  %v738_v26 = vmul.f32 %v678_v13, %v678_v13 }
 0x186   : > { %v693_v15 = vadd.f32 %v1109_v0, %v1086_v14  ;;  %v542_v16 = vpop.f32.mrb[5].mxu1 }
 0x187   : > { %v688_v17 = vadd.f32 %v687_v1, %v542_v16 }
 0x188   : > { %721 = vst [vmem:[%s1438_s27 + $0x28] sm:$0xff] %v693_v15  ;;  %v741_v19 = vmul.f32 %v693_v15, %v693_v15 }
 0x189   : > { %720 = vst [vmem:[%s1438_s27 + $0x20] sm:$0xff] %v688_v17  ;;  %v1089_v20 = vpop.f32.mrb[6].mxu1  ;;  %v740_v36 = vmul.f32 %v688_v17, %v688_v17 }
 0x18a   : > { %v746_v21 = vadd.f32 %v741_v19, %v736_v18  ;;  %v703_v22 = vadd.f32 %v1112_v2, %v1089_v20  ;;  %v552_v23 = vpop.f32.mrb[7].mxu1 }
 0x18b   : > { %v698_v24 = vadd.f32 %v697_v3, %v552_v23 }
 0x18c   : > { %1205 = vrsqrt.f32 %v746_v21  ;;  %723 = vst [vmem:[%s1438_s27 + $0x38] sm:$0xff] %v703_v22  ;;  %v743_v27 = vmul.f32 %v703_v22, %v703_v22  ;;  %vm753_vm2 = vcmp.eq.f32.partialorder %v746_v21, inf  ;;  %v756_v43 = vand.u32 2147483648, %v746_v21 }
 0x18d   : > { %722 = vst [vmem:[%s1438_s27 + $0x30] sm:$0xff] %v698_v24  ;;  %v742_v28 = vmul.f32 %v698_v24, %v698_v24  ;;  %v1092_v29 = vpop.f32.mrb[8].mxu1  ;;  %vm755_vm3 = vcmp.eq.f32.partialorder %v746_v21, 0.0 }
 0x18e   : > { %v713_v30 = vadd.f32 %v1115_v4, %v1092_v29  ;;  %v562_v31 = vpop.f32.mrb[9].mxu1  ;;  %v748_v32 = vadd.f32 %v743_v27, %v738_v26 }
 0x18f   : > { %v747_v33 = vadd.f32 %v742_v28, %v737_v25  ;;  %v708_v34 = vadd.f32 %v707_v5, %v562_v31 }
 0x190   : > { %725 = vst [vmem:[%s1438_s27 + $0x48] sm:$0xff] %v713_v30  ;;  %v745_v35 = vmul.f32 %v713_v30, %v713_v30  ;;  %1207 = vrsqrt.f32 %v748_v32  ;;  %vm767_vm4 = vcmp.eq.f32.partialorder %v748_v32, inf  ;;  %v770_v50 = vand.u32 2147483648, %v748_v32 }
 0x191   : > { %724 = vst [vmem:[%s1438_s27 + $0x40] sm:$0xff] %v708_v34  ;;  %1209 = vrsqrt.f32 %v747_v33  ;;  %v744_v38 = vmul.f32 %v708_v34, %v708_v34  ;;  %vm769_vm5 = vcmp.eq.f32.partialorder %v748_v32, 0.0  ;;  %vm760_vm6 = vcmp.eq.f32.partialorder %v747_v33, inf }
 0x192   : > { %v750_v37 = vadd.f32 %v745_v35, %v740_v36  ;;  %v763_v53 = vand.u32 2147483648, %v747_v33  ;;  %vm762_vm7 = vcmp.eq.f32.partialorder %v747_v33, 0.0 }
 0x193   : > { %v749_v41 = vadd.f32 %v744_v38, %v739_v39 }
 0x194   : > { %1211 = vrsqrt.f32 %v750_v37  ;;  %vm781_vm8 = vcmp.eq.f32.partialorder %v750_v37, inf  ;;  %v784_v63 = vand.u32 2147483648, %v750_v37  ;;  %vm783_vm9 = vcmp.eq.f32.partialorder %v750_v37, 0.0 }
 0x195   : > { %1213 = vrsqrt.f32 %v749_v41  ;;  %vm774_vm10 = vcmp.eq.f32.partialorder %v749_v41, inf  ;;  %v777_v7 = vand.u32 2147483648, %v749_v41  ;;  %vm776_vm11 = vcmp.eq.f32.partialorder %v749_v41, 0.0 }
 0x196   : > { %v1206_v40 = vpop.eup %1205 }
 0x197   : > { %v752_v42 = vmul.f32 %v1206_v40, %v746_v21 }
 0x199   : > { %v754_v44 = vsel %vm753_vm2, %v746_v21, %v752_v42 }
 0x19a   : > { %v757_v45 = vsel %vm755_vm3, %v756_v43, %v754_v44  ;;  %v1208_v46 = vpop.eup %1207 }
 0x19b   : > { %v786_v47 = vadd.f32 1.0, %v757_v45  ;;  %v1210_v48 = vpop.eup %1209  ;;  %v766_v49 = vmul.f32 %v1208_v46, %v748_v32  ;;  %v789_v57 = vmul.f32 -0.5, %v757_v45  ;;  %v792_v4 = vand.u32 2147483647, %v757_v45 }
 0x19c   : > { %v759_v51 = vmul.f32 %v1210_v48, %v747_v33 }
 0x19d   : > { %1215 = vlog2.f32 %v786_v47  ;;  %v768_v52 = vsel %vm767_vm4, %v748_v32, %v766_v49  ;;  %v790_v1 = vadd.f32 1.0, %v789_v57  ;;  %vm793_vm12 = vcmp.lt.f32.partialorder %v792_v4, 0.0004427343 }
 0x19e   : > { %v1212_v54 = vpop.eup %1211  ;;  %v771_v55 = vsel %vm769_vm5, %v770_v50, %v768_v52  ;;  %v761_v56 = vsel %vm760_vm6, %v747_v33, %v759_v51 }
 0x19f   : > { %v804_v58 = vadd.f32 1.0, %v771_v55  ;;  %v764_v59 = vsel %vm762_vm7, %v763_v53, %v761_v56  ;;  %v780_v61 = vmul.f32 %v1212_v54, %v750_v37  ;;  %v1214_v62 = vpop.eup %1213  ;;  %v807_v5 = vmul.f32 -0.5, %v771_v55 }
 0x1a0   : > { %v795_v60 = vadd.f32 1.0, %v764_v59  ;;  %v773_v3 = vmul.f32 %v1214_v62, %v749_v41  ;;  %v798_v8 = vmul.f32 -0.5, %v764_v59  ;;  %v791_v13 = vmul.f32 %v790_v1, %v757_v45 }
 0x1a1   : > { %1217 = vlog2.f32 %v804_v58  ;;  %v782_v0 = vsel %vm781_vm8, %v750_v37, %v780_v61  ;;  %v808_v15 = vadd.f32 1.0, %v807_v5  ;;  %v810_v16 = vand.u32 2147483647, %v771_v55 }
 0x1a2   : > { %1219 = vlog2.f32 %v795_v60  ;;  %v785_v2 = vsel %vm783_vm9, %v784_v63, %v782_v0  ;;  %v775_v9 = vsel %vm774_vm10, %v749_v41, %v773_v3  ;;  %v799_v18 = vadd.f32 1.0, %v798_v8 }
 0x1a3   : > { %v822_v6 = vadd.f32 1.0, %v785_v2  ;;  %v778_v11 = vsel %vm776_vm11, %v777_v7, %v775_v9  ;;  %v825_v19 = vmul.f32 -0.5, %v785_v2  ;;  %v801_v20 = vand.u32 2147483647, %v764_v59 }
 0x1a4   : > { %v813_v14 = vadd.f32 1.0, %v778_v11  ;;  %v809_v24 = vmul.f32 %v808_v15, %v771_v55  ;;  %v816_v25 = vmul.f32 -0.5, %v778_v11  ;;  %vm811_vm13 = vcmp.lt.f32.partialorder %v810_v16, 0.0004427343 }
 0x1a5   : > { %1221 = vlog2.f32 %v822_v6  ;;  %v800_v27 = vmul.f32 %v799_v18, %v764_v59  ;;  %v826_v28 = vadd.f32 1.0, %v825_v19  ;;  %vm802_vm14 = vcmp.lt.f32.partialorder %v801_v20, 0.0004427343 }
 0x1a6   : > { %1223 = vlog2.f32 %v813_v14  ;;  %v828_v30 = vand.u32 2147483647, %v785_v2  ;;  %v817_v33 = vadd.f32 1.0, %v816_v25  ;;  %v819_v36 = vand.u32 2147483647, %v778_v11 }
 0x1a7   : > { %v1216_v10 = vpop.eup %1215  ;;  %v827_v35 = vmul.f32 %v826_v28, %v785_v2 }
 0x1a8   : > { %v788_v12 = vmul.f32 0.6931472, %v1216_v10  ;;  %vm829_vm15 = vcmp.lt.f32.partialorder %v828_v30, 0.0004427343  ;;  %v818_v40 = vmul.f32 %v817_v33, %v778_v11  ;;  %vm820_vm0 = vcmp.lt.f32.partialorder %v819_v36, 0.0004427343 }
 0x1aa   : > { %v794_v17 = vsel %vm793_vm12, %v791_v13, %v788_v12 }
 0x1ab   : > { %831 = vst [vmem:[%s1454_s5] sm:$0xff] %v794_v17  ;;  %v1218_v21 = vpop.eup %1217 }
 0x1ac   : > { %v1220_v22 = vpop.eup %1219  ;;  %v806_v23 = vmul.f32 0.6931472, %v1218_v21 }
 0x1ad   : > { %v797_v26 = vmul.f32 0.6931472, %v1220_v22 }
 0x1ae   : > { %v812_v29 = vsel %vm811_vm13, %v809_v24, %v806_v23 }
 0x1af   : > { %833 = vst [vmem:[%s1454_s5 + $0x10] sm:$0xff] %v812_v29  ;;  %v803_v31 = vsel %vm802_vm14, %v800_v27, %v797_v26  ;;  %v1222_v32 = vpop.eup %1221 }
 0x1b0   : > { %832 = vst [vmem:[%s1454_s5 + $0x8] sm:$0xff] %v803_v31  ;;  %v824_v34 = vmul.f32 0.6931472, %v1222_v32  ;;  %v1224_v37 = vpop.eup %1223 }
 0x1b1   : > { %v815_v39 = vmul.f32 0.6931472, %v1224_v37 }
 0x1b2   : > { %v830_v38 = vsel %vm829_vm15, %v827_v35, %v824_v34 }
 0x1b3   : > { %835 = vst [vmem:[%s1454_s5 + $0x20] sm:$0xff] %v830_v38  ;;  %v821_v41 = vsel %vm820_vm0, %v818_v40, %v815_v39 }
 0x1b4   : > { %834 = vst [vmem:[%s1454_s5 + $0x18] sm:$0xff] %v821_v41 }
 0x1b5 PF: > { %s15_s19 = sadd.s32 1, %s1263_s19   ;;  %s1482_s15 = smov %s1251_s16 }
 0x1b6   : > { %p12_p10 = scmp.ge.s32.totalorder %s15_s19, 4   ;;  %s1483_s16 = smov %s1330_s24 }
 0x1b7   : > { %s1484_s17 = smov %s1259_s18  ;;  %s1485_s18 = smov %s1487_s20 }
 0x1b8   :  { %14 = sbr.rel (!%p12_p10) target bundleno = 3 (0x3), region = 164 }

</bundles_post_ra>
